<compile_context>
chip_gen: v7x
topology: tpu7x:2x2x1
jax: 0.10.0
libtpu: 0.0.40
codegen_flags: <defaults>
</compile_context>

<pallas_src>
import functools
import math

import jax
import jax.numpy as jnp
from jax.experimental import pallas as pl
from jax.experimental.pallas import tpu as pltpu


def _choose_block_networks(num_networks, batch, in_features, out_features,
                           itemsize=4, step_budget_bytes=4 << 20):
    """Pick how many networks (TN) to process per grid step.

    Constraints:
      * N % TN == 0
      * the x / out slab block last dims (TN*I, TN*O) must be multiples of 128
        unless TN == N (block spans the full dimension).
      * per-step working set (x + weight + bias + out block) stays under a
        conservative budget so double-buffering fits every TPU generation's
        default scoped VMEM.
    """
    N, B, I, O = num_networks, batch, in_features, out_features

    def conforming(t):
        if N % t:
            return False
        if t == N:
            return True
        return (t * I) % 128 == 0 and (t * O) % 128 == 0

    def step_bytes(t):
        return itemsize * t * (B * I + O * I + O + B * O)

    cands = [t for t in range(1, N + 1) if conforming(t)]
    fitting = [t for t in cands if step_bytes(t) <= step_budget_bytes]
    tn = max(fitting) if fitting else min(cands)
    # Prefer >= 2 grid steps (when a conforming half-size block exists) so both
    # v7x TensorCores get work under dimension_semantics=("parallel",).
    if tn == N and N > 1 and (N // 2) in fitting:
        tn = N // 2
    return tn


def _batched_linear_kernel(x_ref, w_ref, b_ref, o_ref, *,
                           tn, in_features, out_features, precision):
    # x_ref: (B, tn*I)   lane-dense x slab for this step's tn networks
    # w_ref: (tn, O, I)  native-layout weights (no transpose anywhere)
    # b_ref: (tn, 1, O)
    # o_ref: (B, tn*O)   lane-dense output slab
    I = in_features
    O = out_features
    # Static unroll over the tn networks of this block: tn small 2-D MXU
    # matmuls, each contracting x's last dim with weight's last dim.
    for n in range(tn):
        x_n = x_ref[:, n * I:(n + 1) * I]      # (B, I) static lane slice
        w_n = w_ref[n]                         # (O, I)
        acc = jax.lax.dot_general(
            x_n, w_n,
            dimension_numbers=(((1,), (1,)), ((), ())),   # contract I with I
            preferred_element_type=jnp.float32,           # f32 accumulation
            precision=precision,
        )                                                  # (B, O)
        o_ref[:, n * O:(n + 1) * O] = (acc + b_ref[n]).astype(o_ref.dtype)


def batched_linear(x, weight, bias, *, block_networks=None,
                   precision=jax.lax.Precision.HIGHEST):
    """x: (B, N, I); weight: (N, O, I); bias: (N, O) -> (B, N, O)."""
    B, N, I = x.shape
    N_w, O, I_w = weight.shape
    assert N == N_w and I == I_w and bias.shape == (N, O)

    itemsize = jnp.dtype(x.dtype).itemsize
    tn = (block_networks if block_networks is not None
          else _choose_block_networks(N, B, I, O, itemsize))
    assert N % tn == 0
    assert tn == N or ((tn * I) % 128 == 0 and (tn * O) % 128 == 0), (
        "block last dims must be multiples of 128 or span the full array")

    # Layout plumbing only (reshapes, no transposes): lane-dense 2-D slabs for
    # x and out, and a bias shape whose trailing block dims equal the array.
    x_slab = x.reshape(B, N * I)
    bias3 = bias.reshape(N, 1, O)

    kernel = functools.partial(
        _batched_linear_kernel, tn=tn, in_features=I, out_features=O,
        precision=precision)

    out_slab = pl.pallas_call(
        kernel,
        out_shape=jax.ShapeDtypeStruct((B, N * O), x.dtype),
        grid_spec=pltpu.PrefetchScalarGridSpec(
            num_scalar_prefetch=0,
            grid=(N // tn,),
            in_specs=[
                pl.BlockSpec((B, tn * I), lambda g: (0, g)),      # x slab
                pl.BlockSpec((tn, O, I), lambda g: (g, 0, 0)),    # weights (native)
                pl.BlockSpec((tn, 1, O), lambda g: (g, 0, 0)),    # bias
            ],
            out_specs=pl.BlockSpec((B, tn * O), lambda g: (0, g)),
        ),
        compiler_params=pltpu.CompilerParams(
            dimension_semantics=("parallel",)),
    )(x_slab, weight, bias3)

    return out_slab.reshape(B, N, O)


def init_params(key, num_networks, in_features, out_features):
    """Deterministic init matching nn.init.kaiming_uniform_(a=sqrt(5)) + zero bias."""
    # kaiming_uniform_ with a=sqrt(5): bound = sqrt(6 / ((1 + a^2) * fan_in))
    #                                        = 1 / sqrt(fan_in)
    bound = 1.0 / math.sqrt(in_features)
    weight = jax.random.uniform(
        key, (num_networks, out_features, in_features),
        minval=-bound, maxval=bound, dtype=jnp.float32)
    bias = jnp.zeros((num_networks, out_features), dtype=jnp.float32)
    return weight, bias


if __name__ == "__main__":
    B = 2               # batch
    N = 4               # num_networks
    I = 16              # in_features
    O = 32              # out_features

    key = jax.random.PRNGKey(0)
    k_x, k_w = jax.random.split(key)

    x = jax.random.normal(k_x, (B, N, I), dtype=jnp.float32)
    weight, bias = init_params(k_w, N, I, O)

    out = batched_linear(x, weight, bias)
    out = jax.block_until_ready(out)

    # Reference in plain JAX (same einsum semantics as the PyTorch module,
    # contracting against the native (N, O, I) weight layout).
    ref = jnp.einsum('bni,noi->bno', x, weight,
                     precision=jax.lax.Precision.HIGHEST) + bias[None]
    assert out.shape == (B, N, O)
    assert jnp.allclose(out, ref, atol=1e-4, rtol=1e-4)

    print("KERNEL_OK")
</pallas_src>

<mosaic_0001>
module attributes {stable_mosaic.version = 11 : i64} {
  func.func @_batched_linear_kernel(%arg0: i32, %arg1: memref<2x64xf32, #tpu.memory_space<vmem>>, %arg2: memref<4x32x16xf32, #tpu.memory_space<vmem>>, %arg3: memref<4x1x32xf32, #tpu.memory_space<vmem>>, %arg4: memref<2x128xf32, #tpu.memory_space<vmem>>) attributes {dimension_semantics = [#tpu.dimension_semantics<parallel>], iteration_bounds = array<i64: 1>, scalar_prefetch = 0 : i64, scratch_operands = 0 : i64, tpu.core_type = #tpu.core_type<tc>, window_params = [{transform_indices = @transform_0, window_bounds = array<i64: 2, 64>}, {transform_indices = @transform_1, window_bounds = array<i64: 4, 32, 16>}, {transform_indices = @transform_2, window_bounds = array<i64: 4, 1, 32>}, {transform_indices = @transform_3, window_bounds = array<i64: 2, 128>}]} {
    %c0 = arith.constant 0 : index
    %c0_0 = arith.constant 0 : index
    %0 = vector.load %arg1[%c0, %c0_0] : memref<2x64xf32, #tpu.memory_space<vmem>>, vector<2x16xf32>
    %c0_1 = arith.constant 0 : index
    %c0_2 = arith.constant 0 : index
    %c0_3 = arith.constant 0 : index
    %1 = vector.load %arg2[%c0_1, %c0_2, %c0_3] : memref<4x32x16xf32, #tpu.memory_space<vmem>>, vector<1x32x16xf32>
    %2 = vector.shape_cast %1 : vector<1x32x16xf32> to vector<32x16xf32>
    %cst = arith.constant dense<0.000000e+00> : vector<2x32xf32>
    %3 = tpu.matmul %0, %2, %cst {dimension_numbers = #tpu.dot_dimension_numbers<[1], [1], [0], [0], [0, 0, 1, 0], [], []>, precision = #tpu.contract_precision<fp32>} : vector<2x16xf32>, vector<32x16xf32>, vector<2x32xf32> -> vector<2x32xf32>
    %c0_4 = arith.constant 0 : index
    %c0_5 = arith.constant 0 : index
    %c0_6 = arith.constant 0 : index
    %4 = vector.load %arg3[%c0_4, %c0_5, %c0_6] : memref<4x1x32xf32, #tpu.memory_space<vmem>>, vector<1x1x32xf32>
    %5 = vector.shape_cast %4 : vector<1x1x32xf32> to vector<1x32xf32>
    %6 = vector.broadcast %5 : vector<1x32xf32> to vector<2x32xf32>
    %7 = arith.addf %3, %6 : vector<2x32xf32>
    %c0_7 = arith.constant 0 : index
    %c0_8 = arith.constant 0 : index
    %8 = vector.load %arg4[%c0_7, %c0_8] : memref<2x128xf32, #tpu.memory_space<vmem>>, vector<2x32xf32>
    tpu.vector_store %arg4[%c0_7, %c0_8], %7 {strides = array<i32>} : memref<2x128xf32, #tpu.memory_space<vmem>>, vector<2x32xf32>,
    %c0_9 = arith.constant 0 : index
    %c16 = arith.constant 16 : index
    %9 = vector.load %arg1[%c0_9, %c16] : memref<2x64xf32, #tpu.memory_space<vmem>>, vector<2x16xf32>
    %c1 = arith.constant 1 : index
    %c0_10 = arith.constant 0 : index
    %c0_11 = arith.constant 0 : index
    %10 = vector.load %arg2[%c1, %c0_10, %c0_11] : memref<4x32x16xf32, #tpu.memory_space<vmem>>, vector<1x32x16xf32>
    %11 = vector.shape_cast %10 : vector<1x32x16xf32> to vector<32x16xf32>
    %cst_12 = arith.constant dense<0.000000e+00> : vector<2x32xf32>
    %12 = tpu.matmul %9, %11, %cst_12 {dimension_numbers = #tpu.dot_dimension_numbers<[1], [1], [0], [0], [0, 0, 1, 0], [], []>, precision = #tpu.contract_precision<fp32>} : vector<2x16xf32>, vector<32x16xf32>, vector<2x32xf32> -> vector<2x32xf32>
    %c1_13 = arith.constant 1 : index
    %c0_14 = arith.constant 0 : index
    %c0_15 = arith.constant 0 : index
    %13 = vector.load %arg3[%c1_13, %c0_14, %c0_15] : memref<4x1x32xf32, #tpu.memory_space<vmem>>, vector<1x1x32xf32>
    %14 = vector.shape_cast %13 : vector<1x1x32xf32> to vector<1x32xf32>
    %15 = vector.broadcast %14 : vector<1x32xf32> to vector<2x32xf32>
    %16 = arith.addf %12, %15 : vector<2x32xf32>
    %c0_16 = arith.constant 0 : index
    %c32 = arith.constant 32 : index
    %17 = vector.load %arg4[%c0_16, %c32] : memref<2x128xf32, #tpu.memory_space<vmem>>, vector<2x32xf32>
    tpu.vector_store %arg4[%c0_16, %c32], %16 {strides = array<i32>} : memref<2x128xf32, #tpu.memory_space<vmem>>, vector<2x32xf32>,
    %c0_17 = arith.constant 0 : index
    %c32_18 = arith.constant 32 : index
    %18 = vector.load %arg1[%c0_17, %c32_18] : memref<2x64xf32, #tpu.memory_space<vmem>>, vector<2x16xf32>
    %c2 = arith.constant 2 : index
    %c0_19 = arith.constant 0 : index
    %c0_20 = arith.constant 0 : index
    %19 = vector.load %arg2[%c2, %c0_19, %c0_20] : memref<4x32x16xf32, #tpu.memory_space<vmem>>, vector<1x32x16xf32>
    %20 = vector.shape_cast %19 : vector<1x32x16xf32> to vector<32x16xf32>
    %cst_21 = arith.constant dense<0.000000e+00> : vector<2x32xf32>
    %21 = tpu.matmul %18, %20, %cst_21 {dimension_numbers = #tpu.dot_dimension_numbers<[1], [1], [0], [0], [0, 0, 1, 0], [], []>, precision = #tpu.contract_precision<fp32>} : vector<2x16xf32>, vector<32x16xf32>, vector<2x32xf32> -> vector<2x32xf32>
    %c2_22 = arith.constant 2 : index
    %c0_23 = arith.constant 0 : index
    %c0_24 = arith.constant 0 : index
    %22 = vector.load %arg3[%c2_22, %c0_23, %c0_24] : memref<4x1x32xf32, #tpu.memory_space<vmem>>, vector<1x1x32xf32>
    %23 = vector.shape_cast %22 : vector<1x1x32xf32> to vector<1x32xf32>
    %24 = vector.broadcast %23 : vector<1x32xf32> to vector<2x32xf32>
    %25 = arith.addf %21, %24 : vector<2x32xf32>
    %c0_25 = arith.constant 0 : index
    %c64 = arith.constant 64 : index
    %26 = vector.load %arg4[%c0_25, %c64] : memref<2x128xf32, #tpu.memory_space<vmem>>, vector<2x32xf32>
    tpu.vector_store %arg4[%c0_25, %c64], %25 {strides = array<i32>} : memref<2x128xf32, #tpu.memory_space<vmem>>, vector<2x32xf32>,
    %c0_26 = arith.constant 0 : index
    %c48 = arith.constant 48 : index
    %27 = vector.load %arg1[%c0_26, %c48] : memref<2x64xf32, #tpu.memory_space<vmem>>, vector<2x16xf32>
    %c3 = arith.constant 3 : index
    %c0_27 = arith.constant 0 : index
    %c0_28 = arith.constant 0 : index
    %28 = vector.load %arg2[%c3, %c0_27, %c0_28] : memref<4x32x16xf32, #tpu.memory_space<vmem>>, vector<1x32x16xf32>
    %29 = vector.shape_cast %28 : vector<1x32x16xf32> to vector<32x16xf32>
    %cst_29 = arith.constant dense<0.000000e+00> : vector<2x32xf32>
    %30 = tpu.matmul %27, %29, %cst_29 {dimension_numbers = #tpu.dot_dimension_numbers<[1], [1], [0], [0], [0, 0, 1, 0], [], []>, precision = #tpu.contract_precision<fp32>} : vector<2x16xf32>, vector<32x16xf32>, vector<2x32xf32> -> vector<2x32xf32>
    %c3_30 = arith.constant 3 : index
    %c0_31 = arith.constant 0 : index
    %c0_32 = arith.constant 0 : index
    %31 = vector.load %arg3[%c3_30, %c0_31, %c0_32] : memref<4x1x32xf32, #tpu.memory_space<vmem>>, vector<1x1x32xf32>
    %32 = vector.shape_cast %31 : vector<1x1x32xf32> to vector<1x32xf32>
    %33 = vector.broadcast %32 : vector<1x32xf32> to vector<2x32xf32>
    %34 = arith.addf %30, %33 : vector<2x32xf32>
    %c0_33 = arith.constant 0 : index
    %c96 = arith.constant 96 : index
    %35 = vector.load %arg4[%c0_33, %c96] : memref<2x128xf32, #tpu.memory_space<vmem>>, vector<2x32xf32>
    tpu.vector_store %arg4[%c0_33, %c96], %34 {strides = array<i32>} : memref<2x128xf32, #tpu.memory_space<vmem>>, vector<2x32xf32>,
    return
  }
  func.func @transform_0(%arg0: i32) -> (i32, i32) {
    %c0_i32 = arith.constant 0 : i32
    %c0_i32_0 = arith.constant 0 : i32
    return %c0_i32, %arg0 : i32, i32
  }
  func.func @transform_1(%arg0: i32) -> (i32, i32, i32) {
    %c0_i32 = arith.constant 0 : i32
    %c0_i32_0 = arith.constant 0 : i32
    %c0_i32_1 = arith.constant 0 : i32
    return %arg0, %c0_i32, %c0_i32_0 : i32, i32, i32
  }
  func.func @transform_2(%arg0: i32) -> (i32, i32, i32) {
    %c0_i32 = arith.constant 0 : i32
    %c0_i32_0 = arith.constant 0 : i32
    %c0_i32_1 = arith.constant 0 : i32
    return %arg0, %c0_i32, %c0_i32_0 : i32, i32, i32
  }
  func.func @transform_3(%arg0: i32) -> (i32, i32) {
    %c0_i32 = arith.constant 0 : i32
    %c0_i32_0 = arith.constant 0 : i32
    return %c0_i32, %arg0 : i32, i32
  }
}

</mosaic_0001>

<bundles_post_ra>
// kernel: tpu_custom_call.1
= control target key start
LH: loop header
LB: loop body
LE: loop exit
PB: predicated region body
PF: predicated region fallthrough
CT: control target
= control target key end

     0   :  { %s2734_s16 = smov 112   ;;  %vm27_vm0 = vcmask 130048   ;;  %v2735_v5 = vmov 0.0|0.0   ;;  %vm2736_vm1 = vmmov 0   ;;  %v2737_v12 = vmov 0.0   ;;  %s2738_s4 = smov 96   ;;  %s3140_s0 = inlined_call_operand.vmem [shape: f32[2,64], index: 0, kind: input, shape index: {}]   ;;  %s3141_s1 = inlined_call_operand.vmem [shape: f32[4,32,16], index: 1, kind: input, shape index: {}]   ;;  %s3142_s2 = inlined_call_operand.vmem [shape: f32[4,1,32], index: 2, kind: input, shape index: {}]   ;;  %s3143_s3 = inlined_call_operand.hbm [shape: f32[2,128], index: 3, kind: output, shape index: {}]  }
   0x1   :  { %v530_v0 = vld [vmem:[%s3140_s0] sm:$0x3]  ;;  %v17_v3 = vld [vmem:[%s3141_s1 + $0x8] sm:$0xff]  ;;  %v18_v4 = vld [vmem:[%s3141_s1 + $0x10] sm:$0xff]  ;;  %2513 = vmatprep.subr.bf16.mxu0 %v2735_v5  ;;  %2549 = vmatprep.subr.bf16.mxu1 %v2735_v5 }
   0x2   :  { %v1052_v1 = vld [vmem:[%s3140_s0] sm:$0x3]  ;;  %545 = vrot.lane.b32.xlu0 %v530_v0, %s2734_s16  ;;  %v35_v7 = vsel %vm27_vm0, %v17_v3, 0  ;;  %v19_v8 = vld [vmem:[%s3141_s1 + $0x18] sm:$0xff]  ;;  %v38_v11 = vsel %vm27_vm0, %v18_v4, 0  ;;  %2257 = vmatprep.mubr.msk.f32.mxu0 %vm2736_vm1, %v2737_v12  ;;  %v2112_v21 = vld [vmem:[%s3141_s1 + $0x28] sm:$0xff] }
   0x3   :  { %v16_v2 = vld [vmem:[%s3141_s1] sm:$0xff]  ;;  %v47_v10 = vand.u32 4294901760, %v35_v7  ;;  %2323 = vmatprep.mubr.msk.f32.mxu1 %vm2736_vm1, %v2737_v12  ;;  %v41_v14 = vsel %vm27_vm0, %v19_v8, 0  ;;  %v50_v22 = vand.u32 4294901760, %v38_v11 }
   0x4   :  { %v32_v6 = vsel %vm27_vm0, %v16_v2, 0  ;;  %v15_v13 = vld [vmem:[%s3140_s0] sm:$0x3]  ;;  %v53_v24 = vand.u32 4294901760, %v41_v14 }
   0x5   :  { %v44_v9 = vand.u32 4294901760, %v32_v6  ;;  %v29_v15 = vsel %vm27_vm0, %v15_v13, 0  ;;  %v1574_v16 = vld [vmem:[%s3140_s0] sm:$0x3]  ;;  %v2806_v20 = vsub.f32 %v35_v7, %v47_v10  ;;  %s2739_s0 = smov 80  }
   0x6   :  { %v2111_v17 = vld [vmem:[%s3141_s1 + $0x20] sm:$0xff]  ;;  %1067 = vrot.lane.b32.xlu0 %v1052_v1, %s2738_s4  ;;  %v2811_v23 = vand.u32 4294901760, %v29_v15  ;;  %1589 = vrot.lane.b32.xlu1 %v1574_v16, %s2739_s0 }
   0x7   :  { %v2802_v18 = vpack.c.bf16 %v47_v10, %v44_v9  ;;  %v2804_v19 = vsub.f32 %v32_v6, %v44_v9  ;;  %v132_v26 = vand.u32 4294901760, %v2806_v20  ;;  %v550_v27 = vsel %vm27_vm0, %v2111_v17, 0 }
   0x9   :  { %2515 = vmatpush3.bf16.xpose.msra.mxu0 %v2802_v18  ;;  %v125_v25 = vand.u32 4294901760, %v2804_v19 }
   0xa   :  { %8 = vsyncpa [#allocation3], 0  ;;  %2516 = vmatprep.subr.bf16.mxu0 %v2735_v5  ;;  %v2819_v28 = vsub.f32 %v29_v15, %v2811_v23  ;;  %v553_v29 = vsel %vm27_vm0, %v2112_v21, 0  ;;  %v2822_v30 = vsub.f32 %v38_v11, %v50_v22  ;;  %v2824_v31 = vsub.f32 %v41_v14, %v53_v24  ;;  %v2113_v39 = vld [vmem:[%s3141_s1 + $0x30] sm:$0xff]  ;;  %v2114_v40 = vld [vmem:[%s3141_s1 + $0x38] sm:$0xff]  ;;  %s2740_s6 = smov 32  }
   0xb   :  { %v562_v33 = vand.u32 4294901760, %v550_v27  ;;  %v2827_v34 = vpack.c.bf16 %v53_v24, %v50_v22  ;;  %v126_v35 = vsub.f32 %v2804_v19, %v125_v25  ;;  %v133_v36 = vsub.f32 %v2806_v20, %v132_v26  ;;  %s2741_s0 = smov 64   ;;  %s2742_s9 = smov [#allocation2]  }
   0xc   :  { %v114_v32 = vand.u32 4294901760, %v2819_v28  ;;  %v565_v37 = vand.u32 4294901760, %v553_v29  ;;  %v139_v44 = vand.u32 4294901760, %v2822_v30  ;;  %v146_v45 = vand.u32 4294901760, %v2824_v31  ;;  %s2102_s10 = sshll.u32 %s2742_s9, 4  ;;  %s2103_s10 = int_to_ptr.vmem [resolvable:$true] %s2102_s10 }
   0xd   :  { %v2835_v38 = vsub.f32 %v550_v27, %v562_v33  ;;  %v127_v46 = vand.u32 4294901760, %v126_v35  ;;  %v134_v47 = vand.u32 4294901760, %v133_v36  ;;  %v556_v48 = vsel %vm27_vm0, %v2113_v39, 0  ;;  %s2710_s11 = scalar_lea.vmem %s2103_s10, 32  ;;  %p2715_p1 = scmp.lt.s32.totalorder %s2103_s10, %s2103_s10 }
   0xe   :  { %v2843_v41 = vpack.c.bf16 %v565_v37, %v562_v33  ;;  %v2845_v42 = vsub.f32 %v553_v29, %v565_v37  ;;  %v115_v43 = vsub.f32 %v2819_v28, %v114_v32  ;;  %v559_v49 = vsel %vm27_vm0, %v2114_v40, 0  ;;  %v2119_v29 = vld [vmem:[%s3141_s1 + $0x50] sm:$0xff]  ;;  %p2711_p0 = scmp.ne.s32.totalorder %s2103_s10, %s2710_s11  ;;  %p2716_p2 = scmp.lt.s32.totalorder %s2710_s11, %s2710_s11 }
   0xf   :  { %v568_v50 = vand.u32 4294901760, %v556_v48  ;;  %v571_v51 = vand.u32 4294901760, %v559_v49  ;;  %v643_v52 = vand.u32 4294901760, %v2835_v38  ;;  %v2520_v56 = vpack.c.bf16 %v134_v47, %v127_v46 }
  0x10   :  { %2551 = vmatpush3.bf16.xpose.msra.mxu1 %v2843_v41  ;;  %v116_v53 = vand.u32 4294901760, %v115_v43  ;;  %v650_v55 = vand.u32 4294901760, %v2845_v42  ;;  %v140_v57 = vsub.f32 %v2822_v30, %v139_v44  ;;  %v147_v58 = vsub.f32 %v2824_v31, %v146_v45  ;;  %p2717_p3 = por %p2716_p2, %p2715_p1 }
  0x11   :  { %2518 = vmatpush3.bf16.xpose.msra.mxu0 %v2827_v34  ;;  %2552 = vmatprep.subr.bf16.mxu1 %v2735_v5  ;;  %v2859_v54 = vsub.f32 %v556_v48, %v568_v50  ;;  %v2868_v59 = vsub.f32 %v559_v49, %v571_v51  ;;  %v2870_v60 = vpack.c.bf16 %v571_v51, %v568_v50  ;;  %vm528_vm2 = vcmask 254976  }
  0x12   :  { %2519 = vmatprep.subr.bf16.mxu0 %v2735_v5  ;;  %v644_v61 = vsub.f32 %v2835_v38, %v643_v52  ;;  %v651_v62 = vsub.f32 %v2845_v42, %v650_v55  ;;  %v141_v3 = vand.u32 4294901760, %v140_v57  ;;  %v148_v4 = vand.u32 4294901760, %v147_v58  ;;  %p2718_p4 = pnand %p2717_p3, %p2711_p0 }
  0x13   :  { %v657_v63 = vand.u32 4294901760, %v2859_v54  ;;  %v664_v0 = vand.u32 4294901760, %v2868_v59  ;;  %v2562_v9 = vpack.c.bf16 %v2845_v42, %v2835_v38  ;;  %v2565_v13 = vpack.c.bf16 %v2868_v59, %v2859_v54 }
  0x14   :  { %v645_v1 = vand.u32 4294901760, %v644_v61  ;;  %v652_v2 = vand.u32 4294901760, %v651_v62  ;;  %v2523_v14 = vpack.c.bf16 %v148_v4, %v141_v3  ;;  %v2526_v16 = vpack.c.bf16 %v2806_v20, %v2804_v19  ;;  %v2117_v19 = vld [vmem:[%s3141_s1 + $0x40] sm:$0xff]  ;;  %v2118_v20 = vld [vmem:[%s3141_s1 + $0x48] sm:$0xff] }
  0x15   :  { %v658_v6 = vsub.f32 %v2859_v54, %v657_v63  ;;  %v665_v7 = vsub.f32 %v2868_v59, %v664_v0  ;;  %v2529_v17 = vpack.c.bf16 %v2824_v31, %v2822_v30  ;;  %v2900_v21 = vpack.c.bf16 %v650_v55, %v643_v52  ;;  %v2120_v30 = vld [vmem:[%s3141_s1 + $0x58] sm:$0xff]  ;;  %v2123_v59 = vld [vmem:[%s3141_s1 + $0x60] sm:$0xff] }
  0x16   :  { %v2882_v8 = vpack.c.bf16 %v652_v2, %v645_v1  ;;  %v2903_v22 = vpack.c.bf16 %v664_v0, %v657_v63  ;;  %v2538_v24 = vpack.c.bf16 %v132_v26, %v125_v25  ;;  %v2541_v27 = vpack.c.bf16 %v146_v45, %v139_v44 }
  0x17   :  { %v659_v10 = vand.u32 4294901760, %v658_v6  ;;  %v666_v11 = vand.u32 4294901760, %v665_v7  ;;  %v1072_v25 = vsel %vm27_vm0, %v2117_v19, 0  ;;  %v1075_v26 = vsel %vm27_vm0, %v2118_v20, 0 }
  0x18   :  { %2258 = vmatmul.mubr.f32.vlgmr.msra.gmra.mrb[0].mxu0 %v116_v53  ;;  %2554 = vmatpush3.bf16.xpose.msra.mxu1 %v2870_v60  ;;  %v1081_v33 = vsel %vm27_vm0, %v2120_v30, 0  ;;  %vm1050_vm3 = vcmask 517376   ;;  %vm1572_vm4 = vcmask 779776   ;;  %vm2094_vm5 = vcmask 1042176  }
  0x19   :  { %2521 = vmatpush3.bf16.xpose.msra.mxu0 %v2520_v56  ;;  %2268 = vmatprep.mubr.msk.f32.mxu0 %vm2736_vm1, %v2737_v12  ;;  %v2889_v15 = vpack.c.bf16 %v666_v11, %v659_v10  ;;  %v1093_v35 = vand.u32 4294901760, %v1081_v33 }
  0x1a   :  { %2522 = vmatprep.subr.bf16.mxu0 %v2735_v5  ;;  %2555 = vmatprep.subr.bf16.mxu1 %v2735_v5 }
  0x1b   :  { %v2975_v50 = vsub.f32 %v1081_v33, %v1093_v35 }
  0x1d   :  { %v1186_v63 = vand.u32 4294901760, %v2975_v50 }
  0x1f   :  { %v1187_v6 = vsub.f32 %v2975_v50, %v1186_v63 }
  0x21   :  { %2524 = vmatpush3.bf16.xpose.msra.mxu0 %v2523_v14  ;;  %v1188_v11 = vand.u32 4294901760, %v1187_v6  ;;  %v2128_v6 = vld [vmem:[%s3142_s2 + $0x3] ss:$0 sm:$0xff] }
  0x22   :  { %2525 = vmatprep.subr.bf16.mxu0 %v2735_v5 }
  0x28   :  { %2269 = vmatmul.mubr.f32.vlgmr.msra.gmra.mrb[0].mxu0 %v2811_v23 }
  0x29   :  { %2527 = vmatpush3.bf16.xpose.msra.mxu0 %v2526_v16  ;;  %2279 = vmatprep.mubr.msk.f32.mxu0 %vm2736_vm1, %v2737_v12 }
  0x2a   :  { %2528 = vmatprep.subr.bf16.mxu0 %v2735_v5 }
  0x31   :  { %2530 = vmatpush3.bf16.xpose.msra.mxu0 %v2529_v17 }
  0x32   :  { %2531 = vmatprep.subr.bf16.mxu0 %v2735_v5 }
  0x38   :  { %2280 = vmatmul.mubr.f32.vlgmr.msra.gmra.mrb[0].mxu0 %v2819_v28  ;;  %v1087_v28 = vand.u32 4294901760, %v1075_v26 }
  0x39   :  { %2533 = vmatpush3.bf16.xpose.msra.mxu0 %v2802_v18  ;;  %2290 = vmatprep.mubr.msk.f32.mxu0 %vm2736_vm1, %v2737_v12 }
  0x3a   :  { %2534 = vmatprep.subr.bf16.mxu0 %v2735_v5  ;;  %v2961_v39 = vsub.f32 %v1075_v26, %v1087_v28 }
  0x3c   :  { %v1172_v44 = vand.u32 4294901760, %v2961_v39 }
  0x3e   :  { %v1173_v52 = vsub.f32 %v2961_v39, %v1172_v44 }
  0x40   :  { %v1174_v61 = vand.u32 4294901760, %v1173_v52 }
  0x41   :  { %2536 = vmatpush3.bf16.xpose.msra.mxu0 %v2827_v34 }
  0x42   :  { %2537 = vmatprep.subr.bf16.mxu0 %v2735_v5 }
  0x48   :  { %2291 = vmatmul.mubr.f32.vlgmr.msra.gmra.mrb[0].mxu0 %v114_v32  ;;  %v1078_v32 = vsel %vm27_vm0, %v2119_v29, 0 }
  0x49   :  { %2539 = vmatpush3.bf16.xpose.msra.mxu0 %v2538_v24  ;;  %2301 = vmatprep.mubr.msk.f32.mxu0 %vm2736_vm1, %v2737_v12 }
  0x4a   :  { %2540 = vmatprep.subr.bf16.mxu0 %v2735_v5 }
  0x51   :  { %2542 = vmatpush3.bf16.xpose.msra.mxu0 %v2541_v27 }
  0x52   :  { %2543 = vmatprep.subr.bf16.mxu0 %v2735_v5 }
  0x58   :  { %2302 = vmatmul.mubr.f32.vlgmr.msra.gmra.mrb[0].mxu0 %v2811_v23 }
  0x59   :  { %2545 = vmatpush3.bf16.xpose.msra.mxu0 %v2802_v18  ;;  %2312 = vmatprep.mubr.msk.f32.mxu0 %vm2736_vm1, %v2737_v12  ;;  %v1084_v18 = vand.u32 4294901760, %v1072_v25 }
  0x5a   :  { %2546 = vmatprep.subr.bf16.mxu0 %v2735_v5 }
  0x5b   :  { %v2947_v31 = vpack.c.bf16 %v1087_v28, %v1084_v18  ;;  %v2959_v37 = vsub.f32 %v1072_v25, %v1084_v18 }
  0x5d   :  { %v1165_v43 = vand.u32 4294901760, %v2959_v37  ;;  %v2598_v14 = vpack.c.bf16 %v2961_v39, %v2959_v37 }
  0x5f   :  { %v1166_v51 = vsub.f32 %v2959_v37, %v1165_v43  ;;  %v2610_v42 = vpack.c.bf16 %v1172_v44, %v1165_v43 }
  0x61   :  { %2548 = vmatpush3.bf16.xpose.msra.mxu0 %v2827_v34  ;;  %v1090_v34 = vand.u32 4294901760, %v1078_v32  ;;  %v1167_v58 = vand.u32 4294901760, %v1166_v51 }
  0x62   :  { %2585 = vmatprep.subr.bf16.mxu0 %v2735_v5 }
  0x63   :  { %v2956_v36 = vpack.c.bf16 %v1093_v35, %v1090_v34  ;;  %v2972_v48 = vsub.f32 %v1078_v32, %v1090_v34  ;;  %v2592_v3 = vpack.c.bf16 %v1174_v61, %v1167_v58 }
  0x65   :  { %v1179_v62 = vand.u32 4294901760, %v2972_v48  ;;  %v2601_v38 = vpack.c.bf16 %v2975_v50, %v2972_v48 }
  0x67   :  { %v1180_v4 = vsub.f32 %v2972_v48, %v1179_v62  ;;  %v2613_v54 = vpack.c.bf16 %v1186_v63, %v1179_v62  ;;  %v2116_v63 = vld [vmem:[%s3142_s2 + $0x1] ss:$0 sm:$0xff] }
  0x68   :  { %2313 = vmatmul.mubr.f32.vlgmr.msra.gmra.mrb[0].mxu0 %v2811_v23 }
  0x69   :  { %2587 = vmatpush3.bf16.xpose.msra.mxu0 %v2947_v31  ;;  %2389 = vmatprep.mubr.msk.f32.mxu0 %vm2736_vm1, %v2737_v12  ;;  %v1181_v10 = vand.u32 4294901760, %v1180_v4 }
  0x6a   :  { %2588 = vmatprep.subr.bf16.mxu0 %v2735_v5 }
  0x71   :  { %2590 = vmatpush3.bf16.xpose.msra.mxu0 %v2956_v36 }
  0x72   :  { %2591 = vmatprep.subr.bf16.mxu0 %v2735_v5 }
  0x74   :  { %v546_v23 = vpop.permute.xlu0 %545 }
  0x75   :  { %v547_v40 = vsel %vm27_vm0, %v546_v23, 0 }
  0x76   :  { %v2967_v45 = vand.u32 4294901760, %v547_v40 }
  0x78   :  { %v2970_v46 = vsub.f32 %v547_v40, %v2967_v45  ;;  %v1068_v47 = vpop.permute.xlu0 %1067 }
  0x79   :  { %v1069_v49 = vsel %vm27_vm0, %v1068_v47, 0 }
  0x7a   :  { %v632_v53 = vand.u32 4294901760, %v2970_v46  ;;  %v2984_v55 = vand.u32 4294901760, %v1069_v49 }
  0x7c   :  { %v1153_v56 = vsub.f32 %v1069_v49, %v2984_v55  ;;  %v633_v57 = vsub.f32 %v2970_v46, %v632_v53 }
  0x7e   :  { %v1154_v0 = vand.u32 4294901760, %v1153_v56  ;;  %v634_v1 = vand.u32 4294901760, %v633_v57  ;;  %v2110_v57 = vld [vmem:[%s3142_s2] ss:$0 sm:$0xff] }
  0x80   :  { %v1155_v2 = vsub.f32 %v1153_v56, %v1154_v0  ;;  %2324 = vmatmul.mubr.f32.vlgmr.msra.gmra.mrb[0].mxu1 %v634_v1 }
  0x81   :  { %2557 = vmatpush3.bf16.xpose.msra.mxu1 %v2882_v8  ;;  %2334 = vmatprep.mubr.msk.f32.mxu1 %vm2736_vm1, %v2737_v12  ;;  %v2595_v8 = vpack.c.bf16 %v1188_v11, %v1181_v10 }
  0x82   :  { %v1156_v7 = vand.u32 4294901760, %v1155_v2  ;;  %2558 = vmatprep.subr.bf16.mxu1 %v2735_v5 }
  0x84   :  { %2390 = vmatmul.mubr.f32.vlgmr.msra.gmra.mrb[2].mxu0 %v1156_v7 }
  0x85   :  { %2593 = vmatpush3.bf16.xpose.msra.mxu0 %v2592_v3  ;;  %2400 = vmatprep.mubr.msk.f32.mxu0 %vm2736_vm1, %v2737_v12 }
  0x86   :  { %2594 = vmatprep.subr.bf16.mxu0 %v2735_v5 }
  0x89   :  { %2560 = vmatpush3.bf16.xpose.msra.mxu1 %v2889_v15  ;;  %v1590_v15 = vpop.permute.xlu1 %1589 }
  0x8a   :  { %2561 = vmatprep.subr.bf16.mxu1 %v2735_v5  ;;  %v1591_v24 = vsel %vm27_vm0, %v1590_v15, 0 }
  0x8b   :  { %v3081_v26 = vand.u32 4294901760, %v1591_v24 }
  0x8d   :  { %2596 = vmatpush3.bf16.xpose.msra.mxu0 %v2595_v8 }
  0x8e   :  { %2597 = vmatprep.subr.bf16.mxu0 %v2735_v5 }
  0x90   :  { %2335 = vmatmul.mubr.f32.vlgmr.msra.gmra.mrb[0].mxu1 %v2967_v45 }
  0x91   :  { %2563 = vmatpush3.bf16.xpose.msra.mxu1 %v2562_v9  ;;  %2345 = vmatprep.mubr.msk.f32.mxu1 %vm2736_vm1, %v2737_v12  ;;  %v2124_v9 = vld [vmem:[%s3141_s1 + $0x68] sm:$0xff] }
  0x92   :  { %2564 = vmatprep.subr.bf16.mxu1 %v2735_v5 }
  0x94   :  { %2401 = vmatmul.mubr.f32.vlgmr.msra.gmra.mrb[2].mxu0 %v2984_v55 }
  0x95   :  { %2599 = vmatpush3.bf16.xpose.msra.mxu0 %v2598_v14  ;;  %2411 = vmatprep.mubr.msk.f32.mxu0 %vm2736_vm1, %v2737_v12 }
  0x96   :  { %2600 = vmatprep.subr.bf16.mxu0 %v2735_v5 }
  0x99   :  { %2566 = vmatpush3.bf16.xpose.msra.mxu1 %v2565_v13  ;;  %v1594_v13 = vsel %vm27_vm0, %v2123_v59, 0 }
  0x9a   :  { %2567 = vmatprep.subr.bf16.mxu1 %v2735_v5  ;;  %v1606_v16 = vand.u32 4294901760, %v1594_v13 }
  0x9c   :  { %v1686_v19 = vsub.f32 %v1594_v13, %v1606_v16 }
  0x9d   :  { %2602 = vmatpush3.bf16.xpose.msra.mxu0 %v2601_v38 }
  0x9e   :  { %2603 = vmatprep.subr.bf16.mxu0 %v2735_v5  ;;  %v1687_v29 = vand.u32 4294901760, %v1686_v19 }
  0xa0   :  { %2346 = vmatmul.mubr.f32.vlgmr.msra.gmra.mrb[0].mxu1 %v2970_v46  ;;  %v1688_v35 = vsub.f32 %v1686_v19, %v1687_v29 }
  0xa1   :  { %2569 = vmatpush3.bf16.xpose.msra.mxu1 %v2843_v41  ;;  %2356 = vmatprep.mubr.msk.f32.mxu1 %vm2736_vm1, %v2737_v12 }
  0xa2   :  { %2570 = vmatprep.subr.bf16.mxu1 %v2735_v5  ;;  %v1689_v39 = vand.u32 4294901760, %v1688_v35 }
  0xa4   :  { %2412 = vmatmul.mubr.f32.vlgmr.msra.gmra.mrb[2].mxu0 %v1153_v56 }
  0xa5   :  { %2605 = vmatpush3.bf16.xpose.msra.mxu0 %v2947_v31  ;;  %2422 = vmatprep.mubr.msk.f32.mxu0 %vm2736_vm1, %v2737_v12 }
  0xa6   :  { %2606 = vmatprep.subr.bf16.mxu0 %v2735_v5 }
  0xa9   :  { %2572 = vmatpush3.bf16.xpose.msra.mxu1 %v2870_v60 }
  0xaa   :  { %2573 = vmatprep.subr.bf16.mxu1 %v2735_v5 }
  0xad   :  { %2608 = vmatpush3.bf16.xpose.msra.mxu0 %v2956_v36 }
  0xae   :  { %2609 = vmatprep.subr.bf16.mxu0 %v2735_v5 }
  0xb0   :  { %2357 = vmatmul.mubr.f32.vlgmr.msra.gmra.mrb[0].mxu1 %v632_v53 }
  0xb1   :  { %2575 = vmatpush3.bf16.xpose.msra.mxu1 %v2900_v21  ;;  %2367 = vmatprep.mubr.msk.f32.mxu1 %vm2736_vm1, %v2737_v12  ;;  %v2125_v21 = vld [vmem:[%s3141_s1 + $0x70] sm:$0xff] }
  0xb2   :  { %2576 = vmatprep.subr.bf16.mxu1 %v2735_v5 }
  0xb4   :  { %2423 = vmatmul.mubr.f32.vlgmr.msra.gmra.mrb[2].mxu0 %v1154_v0 }
  0xb5   :  { %2611 = vmatpush3.bf16.xpose.msra.mxu0 %v2610_v42  ;;  %2433 = vmatprep.mubr.msk.f32.mxu0 %vm2736_vm1, %v2737_v12 }
  0xb6   :  { %2612 = vmatprep.subr.bf16.mxu0 %v2735_v5 }
  0xb9   :  { %2578 = vmatpush3.bf16.xpose.msra.mxu1 %v2903_v22  ;;  %v2126_v22 = vld [vmem:[%s3141_s1 + $0x78] sm:$0xff] }
  0xba   :  { %2579 = vmatprep.subr.bf16.mxu1 %v2735_v5  ;;  %v1603_v25 = vsel %vm27_vm0, %v2126_v22, 0 }
  0xbb   :  { %v1615_v28 = vand.u32 4294901760, %v1603_v25 }
  0xbd   :  { %2614 = vmatpush3.bf16.xpose.msra.mxu0 %v2613_v54  ;;  %v1707_v34 = vsub.f32 %v1603_v25, %v1615_v28 }
  0xbe   :  { %2615 = vmatprep.subr.bf16.mxu0 %v2735_v5 }
  0xbf   :  { %v1708_v43 = vand.u32 4294901760, %v1707_v34 }
  0xc0   :  { %2368 = vmatmul.mubr.f32.vlgmr.msra.gmra.mrb[0].mxu1 %v2967_v45 }
  0xc1   :  { %2581 = vmatpush3.bf16.xpose.msra.mxu1 %v2843_v41  ;;  %2378 = vmatprep.mubr.msk.f32.mxu1 %vm2736_vm1, %v2737_v12  ;;  %v1597_v41 = vsel %vm27_vm0, %v2124_v9, 0  ;;  %v1709_v47 = vsub.f32 %v1707_v34, %v1708_v43 }
  0xc2   :  { %2582 = vmatprep.subr.bf16.mxu1 %v2735_v5  ;;  %v1609_v17 = vand.u32 4294901760, %v1597_v41 }
  0xc3   :  { %v1710_v50 = vand.u32 4294901760, %v1709_v47 }
  0xc4   :  { %2434 = vmatmul.mubr.f32.vlgmr.msra.gmra.mrb[2].mxu0 %v2984_v55  ;;  %v3076_v27 = vpack.c.bf16 %v1609_v17, %v1606_v16  ;;  %v1693_v20 = vsub.f32 %v1597_v41, %v1609_v17 }
  0xc5   :  { %2617 = vmatpush3.bf16.xpose.msra.mxu0 %v2947_v31  ;;  %2444 = vmatprep.mubr.msk.f32.mxu0 %vm2736_vm1, %v2737_v12  ;;  %v1675_v31 = vsub.f32 %v1591_v24, %v3081_v26 }
  0xc6   :  { %2618 = vmatprep.subr.bf16.mxu0 %v2735_v5  ;;  %v1694_v30 = vand.u32 4294901760, %v1693_v20  ;;  %v2634_v52 = vpack.c.bf16 %v1693_v20, %v1686_v19 }
  0xc7   :  { %v1676_v37 = vand.u32 4294901760, %v1675_v31 }
  0xc9   :  { %2584 = vmatpush3.bf16.xpose.msra.mxu1 %v2870_v60  ;;  %v1600_v60 = vsel %vm27_vm0, %v2125_v21, 0  ;;  %v1677_v44 = vsub.f32 %v1675_v31, %v1676_v37 }
  0xca   :  { %2621 = vmatprep.subr.bf16.mxu1 %v2735_v5  ;;  %v1612_v18 = vand.u32 4294901760, %v1600_v60 }
  0xcb   :  { %v1678_v48 = vand.u32 4294901760, %v1677_v44 }
  0xcc   :  { %v2625_v32 = vpack.c.bf16 %v1615_v28, %v1612_v18  ;;  %v1700_v33 = vsub.f32 %v1600_v60, %v1612_v18 }
  0xcd   :  { %2620 = vmatpush3.bf16.xpose.msra.mxu0 %v2956_v36  ;;  %v1695_v36 = vsub.f32 %v1693_v20, %v1694_v30 }
  0xce   :  { %v1701_v40 = vand.u32 4294901760, %v1700_v33  ;;  %v2637_v53 = vpack.c.bf16 %v1707_v34, %v1700_v33 }
  0xcf   :  { %v1696_v23 = vand.u32 4294901760, %v1695_v36 }
  0xd0   :  { %2379 = vmatmul.mubr.f32.vlgmr.msra.gmra.mrb[0].mxu1 %v2967_v45  ;;  %v1702_v46 = vsub.f32 %v1700_v33, %v1701_v40  ;;  %v2649_v56 = vpack.c.bf16 %v1708_v43, %v1701_v40 }
  0xd1   :  { %2623 = vmatpush3.bf16.xpose.msra.mxu1 %v3076_v27  ;;  %2455 = vmatprep.mubr.msk.f32.mxu1 %vm2736_vm1, %v2737_v12  ;;  %v2628_v45 = vpack.c.bf16 %v1696_v23, %v1689_v39 }
  0xd2   :  { %2624 = vmatprep.subr.bf16.mxu1 %v2735_v5  ;;  %v1703_v49 = vand.u32 4294901760, %v1702_v46 }
  0xd4   :  { %2445 = vmatmul.mubr.f32.vlgmr.msra.gmra.mrb[2].mxu0 %v2984_v55  ;;  %v2631_v51 = vpack.c.bf16 %v1710_v50, %v1703_v49  ;;  %v2646_v55 = vpack.c.bf16 %v1694_v30, %v1687_v29 }
  0xd9   :  { %2626 = vmatpush3.bf16.xpose.msra.mxu1 %v2625_v32 }
  0xda   :  { %2627 = vmatprep.subr.bf16.mxu1 %v2735_v5 }
  0xe0   :  { %2456 = vmatmul.mubr.f32.vlgmr.msra.gmra.mrb[2].mxu1 %v1678_v48 }
  0xe1   :  { %2629 = vmatpush3.bf16.xpose.msra.mxu1 %v2628_v45  ;;  %2466 = vmatprep.mubr.msk.f32.mxu1 %vm2736_vm1, %v2737_v12 }
  0xe2   :  { %2630 = vmatprep.subr.bf16.mxu1 %v2735_v5 }
  0xe9   :  { %2632 = vmatpush3.bf16.xpose.msra.mxu1 %v2631_v51 }
  0xea   :  { %2633 = vmatprep.subr.bf16.mxu1 %v2735_v5 }
  0xf0   :  { %2467 = vmatmul.mubr.f32.vlgmr.msra.gmra.mrb[2].mxu1 %v3081_v26 }
  0xf1   :  { %2635 = vmatpush3.bf16.xpose.msra.mxu1 %v2634_v52  ;;  %2477 = vmatprep.mubr.msk.f32.mxu1 %vm2736_vm1, %v2737_v12 }
  0xf2   :  { %2636 = vmatprep.subr.bf16.mxu1 %v2735_v5 }
  0xf9   :  { %2638 = vmatpush3.bf16.xpose.msra.mxu1 %v2637_v53 }
  0xfa   :  { %2639 = vmatprep.subr.bf16.mxu1 %v2735_v5 }
 0x100   :  { %2478 = vmatmul.mubr.f32.vlgmr.msra.gmra.mrb[2].mxu1 %v1675_v31 }
 0x101   :  { %2641 = vmatpush3.bf16.xpose.msra.mxu1 %v3076_v27  ;;  %2488 = vmatprep.mubr.msk.f32.mxu1 %vm2736_vm1, %v2737_v12 }
 0x102   :  { %2642 = vmatprep.subr.bf16.mxu1 %v2735_v5 }
 0x109   :  { %2644 = vmatpush3.bf16.xpose.msra.mxu1 %v2625_v32 }
 0x10a   :  { %2645 = vmatprep.subr.bf16.mxu1 %v2735_v5 }
 0x110   :  { %2489 = vmatmul.mubr.f32.vlgmr.msra.gmra.mrb[2].mxu1 %v1676_v37 }
 0x111   :  { %2647 = vmatpush3.bf16.xpose.msra.mxu1 %v2646_v55  ;;  %2499 = vmatprep.mubr.msk.f32.mxu1 %vm2736_vm1, %v2737_v12 }
 0x112   :  { %2648 = vmatprep.subr.bf16.mxu1 %v2735_v5 }
 0x119   :  { %2650 = vmatpush3.bf16.xpose.msra.mxu1 %v2649_v56 }
 0x11a   :  { %2651 = vmatprep.subr.bf16.mxu1 %v2735_v5 }
 0x120   :  { %2500 = vmatmul.mubr.f32.vlgmr.msra.gmra.mrb[2].mxu1 %v3081_v26 }
 0x121   :  { %2653 = vmatpush3.bf16.xpose.msra.mxu1 %v3076_v27  ;;  %2510 = vmatprep.mubr.msk.f32.mxu1 %vm2736_vm1, %v2737_v12 }
 0x122   :  { %2654 = vmatprep.subr.bf16.mxu1 %v2735_v5  ;;  %v2122_v5 = vld [vmem:[%s3142_s2 + $0x2] ss:$0 sm:$0xff] }
 0x129   :  { %2656 = vmatpush3.bf16.xpose.msra.mxu1 %v2625_v32 }
 0x130   :  { %2511 = vmatmul.mubr.f32.vlgmr.msra.gmra.mrb[2].mxu1 %v3081_v26 }
 0x13b   :  { %v524_v58 = vpop.f32.mrb[0].mxu0 }
 0x13c   :  { %v2657_v61 = vadd.f32 %v2110_v57, %v524_v58  ;;  %v2314_v62 = vpop.f32.mrb[1].mxu0 }
 0x13e   :  { %529 = vst.msk [vmem:[#allocation2] sm:$0x3] %vm528_vm2, %v2657_v61 }
 0x1a3   :  { %v1042_v0 = vpop.f32.mrb[0].mxu1 }
 0x1a4   :  { %v2658_v12 = vadd.f32 %v2116_v63, %v1042_v0  ;;  %v2380_v1 = vpop.f32.mrb[1].mxu1 }
 0x1a6   :  { %1047 = vrot.lane.b32.xlu1 %v2658_v12, %s2740_s6 }
 0x1a7   :  { %v1564_v2 = vpop.f32.mrb[2].mxu0 }
 0x1a8   :  { %v2659_v3 = vadd.f32 %v2122_v5, %v1564_v2  ;;  %v2446_v4 = vpop.f32.mrb[3].mxu0 }
 0x1aa   :  { %1569 = vrot.lane.b32.xlu0 %v2659_v3, %s2741_s0 }
 0x203   :  { %v2086_v7 = vpop.f32.mrb[2].mxu1 }
 0x204   :  { %v2660_v10 = vadd.f32 %v2128_v6, %v2086_v7  ;;  %v2512_v11 = vpop.f32.mrb[3].mxu1 }
 0x206   :  { %2091 = vrot.lane.b32.xlu1 %v2660_v10, %s2738_s4 }
 0x218   :  { %v1048_v8 = vpop.permute.xlu1 %1047 }
 0x219   :  { %1051 = vst.msk [vmem:[#allocation2] sm:$0x3] %vm1050_vm3, %v1048_v8 }
 0x21c   :  { %v1570_v14 = vpop.permute.xlu0 %1569 }
 0x21d   :  { %1573 = vst.msk [vmem:[#allocation2] sm:$0x3] %vm1572_vm4, %v1570_v14 }
 0x278   :  { %v2092_v38 = vpop.permute.xlu1 %2091 }
 0x279   :  { %2095 = vst.msk [vmem:[#allocation2] sm:$0x3] %vm2094_vm5, %v2092_v38 }
 0x27a   :  { %2721 = shalt.err (!%p2718_p4)
}
 0x27b   :  { %s2722_s12 = scalar_lea.hbm %s3143_s3, 32 }
 0x27c   :  { %p2723_p5 = scmp.ne.s32.totalorder %s3143_s3, %s2722_s12  ;;  %p2726_p6 = scmp.lt.u32.totalorder %s2722_s12, %s3143_s3 }
 0x27e   :  { %p2728_p7 = pnand %p2726_p6, %p2723_p5 }
 0x280   :  { %2731 = shalt.err (!%p2728_p7)
}
 0x281   :  { %2105 = dma.vmem_to_hbm [thread:$0]  %s2103_s10, 32, %s3143_s3, [#allocation3]  }
 0x282   :  { %2732 = dma.done.wait [#allocation3], 32  }
 0x283   :  { %2733 = vsyncadd [#allocation3], 4294967264 }
 0x284   :  { %2109 = vsyncpa [#allocation3], 1 }

</bundles_post_ra>
